<compile_context>
chip_gen: v7x
topology: tpu7x:2x2x1
jax: 0.10.0
libtpu: 0.0.40
codegen_flags: <defaults>
</compile_context>

<pallas_src>
import jax
import jax.numpy as jnp
from jax import lax
from jax.experimental import pallas as pl
from jax.experimental.pallas import tpu as pltpu


# ----------------------------- Pallas kernel -----------------------------
def _up_double_conv_kernel(x_ref, shifts_ref, w1_ref, w2_ref,
                           s1_ref, b1_ref, s2_ref, b2_ref, out_ref):
    """Whole batch in one step: (conv3x3 -> BN -> ReLU) * 2, lane-packed.

    x_ref     : (H, N*W*Cin)          concat(x2, up(x1)), batch block-packed on lanes
    shifts_ref: (2, H, H)  f32        vertical shift matrices (rows h-1 / h+1);
                                      zero rows implement vertical zero padding
    w1_ref    : (3, N*W*Cin, N*W*Cm)  conv1 banded block-diag weights, one per dy
    w2_ref    : (3, N*W*Cm,  N*W*Co)  conv2 banded block-diag weights, one per dy
    s?/b?_ref : (1, N*W*Cm | N*W*Co)  folded BatchNorm scale / bias (f32)
    out_ref   : (H, N*W*Co)           lane-dense output slab (f32)
    """
    f32 = jnp.float32
    x = x_ref[...]
    shift_up = shifts_ref[0]          # row h selects source row h-1
    shift_dn = shifts_ref[1]          # row h selects source row h+1

    # ---- conv1: banded matmuls do the horizontal taps + horizontal padding ----
    t0 = jnp.dot(x, w1_ref[0], preferred_element_type=f32)
    t1 = jnp.dot(x, w1_ref[1], preferred_element_type=f32)
    t2 = jnp.dot(x, w1_ref[2], preferred_element_type=f32)
    # Vertical taps via tiny (H,H) shift matmuls.  (pltpu.roll + one-row mask on
    # the XLU/VPU slots is an alternative if a bundle dump shows MXU saturating.)
    acc1 = (jnp.dot(shift_up, t0, preferred_element_type=f32) + t1 +
            jnp.dot(shift_dn, t2, preferred_element_type=f32))
    y1 = jnp.maximum(acc1 * s1_ref[...] + b1_ref[...], 0.0)       # f32 epilogue
    y1 = y1.astype(w2_ref.dtype)                                  # bf16 path cast

    # ---- conv2: same scheme (no padded scratch, no store/reload round-trip) ----
    u0 = jnp.dot(y1, w2_ref[0], preferred_element_type=f32)
    u1 = jnp.dot(y1, w2_ref[1], preferred_element_type=f32)
    u2 = jnp.dot(y1, w2_ref[2], preferred_element_type=f32)
    acc2 = (jnp.dot(shift_up, u0, preferred_element_type=f32) + u1 +
            jnp.dot(shift_dn, u2, preferred_element_type=f32))
    y2 = jnp.maximum(acc2 * s2_ref[...] + b2_ref[...], 0.0)
    out_ref[...] = y2.astype(out_ref.dtype)


def up_double_conv_pallas(x_slab, packed):
    """x_slab: (H, N*W*Cin) lane-packed slab. Returns (H, N*W*Cout) f32."""
    H, K = x_slab.shape
    Km = packed['s1p'].shape[-1]
    Ko = packed['s2p'].shape[-1]
    return pl.pallas_call(
        _up_double_conv_kernel,
        out_shape=jax.ShapeDtypeStruct((H, Ko), jnp.float32),
        grid_spec=pltpu.PrefetchScalarGridSpec(
            num_scalar_prefetch=0,
            grid=(1,),   # whole problem in one step (batch folded onto lanes)
            in_specs=[
                pl.BlockSpec((H, K), lambda i: (0, 0)),
                pl.BlockSpec((2, H, H), lambda i: (0, 0, 0)),
                pl.BlockSpec((3, K, Km), lambda i: (0, 0, 0)),
                pl.BlockSpec((3, Km, Ko), lambda i: (0, 0, 0)),
                pl.BlockSpec((1, Km), lambda i: (0, 0)),
                pl.BlockSpec((1, Km), lambda i: (0, 0)),
                pl.BlockSpec((1, Ko), lambda i: (0, 0)),
                pl.BlockSpec((1, Ko), lambda i: (0, 0)),
            ],
            out_specs=pl.BlockSpec((H, Ko), lambda i: (0, 0)),
        ),
        compiler_params=pltpu.CompilerParams(dimension_semantics=("arbitrary",)),
    )(x_slab, packed['shifts'], packed['w1'], packed['w2'],
      packed['s1p'], packed['b1p'], packed['s2p'], packed['b2p'])


# -------------------- wrapper-side parameter packing --------------------
def _banded_weight(w_dy, W):
    """w_dy: (3, Cs, Cd) — horizontal taps (dx offsets -1, 0, +1).
    Returns M of shape (W*Cs, W*Cd) with
        M[ws*Cs + c, wo*Cd + d] = w_dy[dx, c, d]  where ws = wo + dx - 1,
    so `x_row @ M` performs the horizontal shift AND the horizontal zero pad."""
    band = jnp.stack([jnp.eye(W, k=1 - dx, dtype=jnp.float32) for dx in range(3)])
    Cs, Cd = w_dy.shape[1], w_dy.shape[2]
    # HIGHEST so the f32 weights are not silently rounded to bf16 by the MXU.
    return jnp.einsum('xsw,xcd->scwd', band, w_dy,
                      precision=lax.Precision.HIGHEST).reshape(W * Cs, W * Cd)


def _pack_conv_weight(w_hwio, W, N, dtype):
    """(3,3,Cs,Cd) HWIO -> (3, N*W*Cs, N*W*Cd): banded + block-diag over batch."""
    eye_n = jnp.eye(N, dtype=jnp.float32)
    mats = [jnp.kron(eye_n, _banded_weight(w_hwio[dy], W)) for dy in range(3)]
    return jnp.stack(mats).astype(dtype)


def _shift_matrices(H):
    """(2, H, H): [0] selects row h-1, [1] selects row h+1 (zero rows = pad)."""
    r = jnp.arange(H)[:, None]
    c = jnp.arange(H)[None, :]
    up = (c == r - 1).astype(jnp.float32)
    dn = (c == r + 1).astype(jnp.float32)
    return jnp.stack([up, dn])


def fold_bn(conv_bias, gamma, beta, mean, var, eps=1e-5):
    """Fold conv bias + eval-mode BatchNorm into per-channel scale/bias."""
    s = gamma / jnp.sqrt(var + eps)
    b = (conv_bias - mean) * s + beta
    return s[None, :], b[None, :]          # (1, C)


def pack_up_params(params, N, H, W, compute_dtype=jnp.float32):
    """Precompute banded / lane-packed parameters consumed by the kernel."""
    s1, b1 = fold_bn(params['cb1'], params['g1'], params['be1'],
                     params['mu1'], params['va1'])
    s2, b2 = fold_bn(params['cb2'], params['g2'], params['be2'],
                     params['mu2'], params['va2'])
    return dict(
        w1=_pack_conv_weight(params['w1'], W, N, compute_dtype),
        w2=_pack_conv_weight(params['w2'], W, N, compute_dtype),
        s1p=jnp.tile(s1, (1, N * W)),
        b1p=jnp.tile(b1, (1, N * W)),
        s2p=jnp.tile(s2, (1, N * W)),
        b2p=jnp.tile(b2, (1, N * W)),
        shifts=_shift_matrices(H),
    )


# ------------------------------ glue (JAX) ------------------------------
def _interp_matrix(out_size, in_size):
    """Bilinear interp matrix, align_corners=True (matches nn.Upsample here)."""
    if in_size == 1:
        return jnp.ones((out_size, 1), jnp.float32)
    pos = jnp.arange(out_size, dtype=jnp.float32) * (in_size - 1) / (out_size - 1)
    lo = jnp.floor(pos).astype(jnp.int32)
    hi = jnp.minimum(lo + 1, in_size - 1)
    frac = pos - lo.astype(jnp.float32)
    m = jnp.zeros((out_size, in_size), jnp.float32)
    m = m.at[jnp.arange(out_size), lo].add(1.0 - frac)
    m = m.at[jnp.arange(out_size), hi].add(frac)
    return m


def bilinear_upsample_x2_align_corners(x_nchw):
    n, c, h, w = x_nchw.shape
    mh = _interp_matrix(2 * h, h)
    mw = _interp_matrix(2 * w, w)
    return jnp.einsum('oh,nchw,pw->ncop', mh, x_nchw, mw,
                      precision=lax.Precision.HIGHEST)


def up_forward(x1, x2, packed):
    """Up.forward: x1 (low-res), x2 (skip) are NCHW f32.  Returns NCHW f32."""
    # 1) bilinear upsample x1 (scale 2, align_corners=True)
    x1u = bilinear_upsample_x2_align_corners(x1)
    # 2) pad x1 to match x2 spatially (F.pad semantics)
    dy = x2.shape[2] - x1u.shape[2]
    dx = x2.shape[3] - x1u.shape[3]
    x1u = jnp.pad(x1u, ((0, 0), (0, 0),
                        (dy // 2, dy - dy // 2),
                        (dx // 2, dx - dx // 2)))
    # 3) channel concat (cheap at this size) then lane-pack batch block-diag
    xcat = jnp.concatenate([x2, x1u], axis=1)              # (N, Cin, H, W)
    N, Cin, H, W = xcat.shape
    # lane index = n*(W*Cin) + w*Cin + c
    x_slab = jnp.transpose(xcat, (2, 0, 3, 1)).reshape(H, N * W * Cin)
    x_slab = x_slab.astype(packed['w1'].dtype)             # bf16 path cast
    # 4) DoubleConv in one Pallas step
    y = up_double_conv_pallas(x_slab, packed)               # (H, N*W*Cout)
    Co = packed['s2p'].shape[-1] // (N * W)
    # TODO(synk): drop this final transpose if the consumer accepts NHWC.
    return jnp.transpose(y.reshape(H, N, W, Co), (1, 3, 0, 2))


# ---------------------------- pure-JAX reference ----------------------------
def ref_up_forward(x1, x2, p, eps=1e-5):
    """Explicit upsample + pad + concat + (conv+bias, eval BN, ReLU) * 2."""
    x1u = bilinear_upsample_x2_align_corners(x1)
    dy = x2.shape[2] - x1u.shape[2]
    dx = x2.shape[3] - x1u.shape[3]
    x1u = jnp.pad(x1u, ((0, 0), (0, 0),
                        (dy // 2, dy - dy // 2),
                        (dx // 2, dx - dx // 2)))
    x = jnp.transpose(jnp.concatenate([x2, x1u], axis=1), (0, 2, 3, 1))
    dn = ('NHWC', 'HWIO', 'NHWC')

    def conv_bn_relu(z, w, cb, g, be, mu, va):
        z = lax.conv_general_dilated(z, w, (1, 1), 'SAME', dimension_numbers=dn,
                                     precision=lax.Precision.HIGHEST) + cb
        z = (z - mu) / jnp.sqrt(va + eps) * g + be      # eval-mode BatchNorm
        return jnp.maximum(z, 0.0)

    y = conv_bn_relu(x, p['w1'], p['cb1'], p['g1'], p['be1'], p['mu1'], p['va1'])
    y = conv_bn_relu(y, p['w2'], p['cb2'], p['g2'], p['be2'], p['mu2'], p['va2'])
    return jnp.transpose(y, (0, 3, 1, 2))


# -------------------------------- main --------------------------------
if __name__ == "__main__":
    # Up(in_channels=8, out_channels=4, bilinear=True)
    in_channels, out_channels = 8, 4
    mid_channels = in_channels // 2          # DoubleConv mid = in_channels // 2
    N, H1, W1 = 2, 8, 8                      # x1: low-res feature map
    H2, W2 = 16, 16                          # x2: skip connection

    key = jax.random.PRNGKey(0)
    keys = jax.random.split(key, 16)

    x1 = jax.random.normal(keys[0], (N, in_channels // 2, H1, W1), jnp.float32)
    x2 = jax.random.normal(keys[1], (N, in_channels // 2, H2, W2), jnp.float32)

    params = dict(
        # conv1: in_channels -> mid_channels ; conv2: mid_channels -> out_channels
        w1=0.1 * jax.random.normal(keys[2], (3, 3, in_channels, mid_channels), jnp.float32),
        cb1=0.05 * jax.random.normal(keys[3], (mid_channels,), jnp.float32),
        g1=1.0 + 0.1 * jax.random.normal(keys[4], (mid_channels,), jnp.float32),
        be1=0.1 * jax.random.normal(keys[5], (mid_channels,), jnp.float32),
        mu1=0.1 * jax.random.normal(keys[6], (mid_channels,), jnp.float32),
        va1=1.0 + 0.1 * jnp.abs(jax.random.normal(keys[7], (mid_channels,), jnp.float32)),
        w2=0.1 * jax.random.normal(keys[8], (3, 3, mid_channels, out_channels), jnp.float32),
        cb2=0.05 * jax.random.normal(keys[9], (out_channels,), jnp.float32),
        g2=1.0 + 0.1 * jax.random.normal(keys[10], (out_channels,), jnp.float32),
        be2=0.1 * jax.random.normal(keys[11], (out_channels,), jnp.float32),
        mu2=0.1 * jax.random.normal(keys[12], (out_channels,), jnp.float32),
        va2=1.0 + 0.1 * jnp.abs(jax.random.normal(keys[13], (out_channels,), jnp.float32)),
    )

    ref = jax.block_until_ready(ref_up_forward(x1, x2, params))
    fwd = jax.jit(up_forward)

    # --- f32 path: exact-in-f32 reformulation, tight tolerance ---
    packed_f32 = pack_up_params(params, N=N, H=H2, W=W2, compute_dtype=jnp.float32)
    out = jax.block_until_ready(fwd(x1, x2, packed_f32))
    assert out.shape == (N, out_channels, H2, W2), out.shape
    err = float(jnp.max(jnp.abs(out - ref)))
    # 1e-4 (not 1e-5): the MXU evaluates f32 matmuls as multi-pass bf16, which
    # differs slightly from the HIGHEST-precision XLA conv reference.
    assert jnp.allclose(out, ref, atol=1e-4, rtol=1e-4), err

    # --- bf16 matmul-operand path (f32 accumulation) for v6e/v7x MXU ---
    packed_bf16 = pack_up_params(params, N=N, H=H2, W=W2, compute_dtype=jnp.bfloat16)
    out_bf16 = jax.block_until_ready(fwd(x1, x2, packed_bf16))
    err_bf16 = float(jnp.max(jnp.abs(out_bf16 - ref)))
    assert jnp.allclose(out_bf16, ref, atol=5e-2, rtol=5e-2), err_bf16

    print("KERNEL_OK")
</pallas_src>

<mosaic_0001>
module attributes {stable_mosaic.version = 11 : i64} {
  func.func private @main(%arg0: i32) attributes {dimension_semantics = [#tpu.dimension_semantics<core_parallel>], iteration_bounds = array<i64: 2>, tpu.core_type = #tpu.core_type<sc_scalar_subcore>, window_params = []} {
    return
  }
}

module attributes {stable_mosaic.version = 11 : i64} {
  func.func private @main(%arg0: i32) attributes {dimension_semantics = [#tpu.dimension_semantics<core_parallel>], iteration_bounds = array<i64: 2>, tpu.core_type = #tpu.core_type<sc_scalar_subcore>, window_params = []} {
    return
  }
}

module attributes {stable_mosaic.version = 11 : i64} {
  func.func @_up_double_conv_kernel(%arg0: i32, %arg1: memref<16x256xf32, #tpu.memory_space<vmem>>, %arg2: memref<2x16x16xf32, #tpu.memory_space<vmem>>, %arg3: memref<3x256x128xf32, #tpu.memory_space<vmem>>, %arg4: memref<3x128x128xf32, #tpu.memory_space<vmem>>, %arg5: memref<1x128xf32, #tpu.memory_space<vmem>>, %arg6: memref<1x128xf32, #tpu.memory_space<vmem>>, %arg7: memref<1x128xf32, #tpu.memory_space<vmem>>, %arg8: memref<1x128xf32, #tpu.memory_space<vmem>>, %arg9: memref<16x128xf32, #tpu.memory_space<vmem>>) attributes {dimension_semantics = [#tpu.dimension_semantics<arbitrary>], iteration_bounds = array<i64: 1>, scalar_prefetch = 0 : i64, scratch_operands = 0 : i64, tpu.core_type = #tpu.core_type<tc>, window_params = [{pipeline_mode = #tpu.pipeline_mode<synchronous>, transform_indices = @transform_0, window_bounds = array<i64: 16, 256>}, {pipeline_mode = #tpu.pipeline_mode<synchronous>, transform_indices = @transform_1, window_bounds = array<i64: 2, 16, 16>}, {pipeline_mode = #tpu.pipeline_mode<synchronous>, transform_indices = @transform_2, window_bounds = array<i64: 3, 256, 128>}, {pipeline_mode = #tpu.pipeline_mode<synchronous>, transform_indices = @transform_3, window_bounds = array<i64: 3, 128, 128>}, {pipeline_mode = #tpu.pipeline_mode<synchronous>, transform_indices = @transform_4, window_bounds = array<i64: 1, 128>}, {pipeline_mode = #tpu.pipeline_mode<synchronous>, transform_indices = @transform_5, window_bounds = array<i64: 1, 128>}, {pipeline_mode = #tpu.pipeline_mode<synchronous>, transform_indices = @transform_6, window_bounds = array<i64: 1, 128>}, {pipeline_mode = #tpu.pipeline_mode<synchronous>, transform_indices = @transform_7, window_bounds = array<i64: 1, 128>}, {pipeline_mode = #tpu.pipeline_mode<synchronous>, transform_indices = @transform_8, window_bounds = array<i64: 16, 128>}]} {
    %c0 = arith.constant 0 : index
    %c0_0 = arith.constant 0 : index
    %0 = vector.load %arg1[%c0, %c0_0] : memref<16x256xf32, #tpu.memory_space<vmem>>, vector<16x256xf32>
    %c0_1 = arith.constant 0 : index
    %c0_2 = arith.constant 0 : index
    %c0_3 = arith.constant 0 : index
    %1 = vector.load %arg2[%c0_1, %c0_2, %c0_3] : memref<2x16x16xf32, #tpu.memory_space<vmem>>, vector<1x16x16xf32>
    %2 = vector.shape_cast %1 : vector<1x16x16xf32> to vector<16x16xf32>
    %c1 = arith.constant 1 : index
    %c0_4 = arith.constant 0 : index
    %c0_5 = arith.constant 0 : index
    %3 = vector.load %arg2[%c1, %c0_4, %c0_5] : memref<2x16x16xf32, #tpu.memory_space<vmem>>, vector<1x16x16xf32>
    %4 = vector.shape_cast %3 : vector<1x16x16xf32> to vector<16x16xf32>
    %c0_6 = arith.constant 0 : index
    %c0_7 = arith.constant 0 : index
    %c0_8 = arith.constant 0 : index
    %5 = vector.load %arg3[%c0_6, %c0_7, %c0_8] : memref<3x256x128xf32, #tpu.memory_space<vmem>>, vector<1x256x128xf32>
    %6 = vector.shape_cast %5 : vector<1x256x128xf32> to vector<256x128xf32>
    %cst = arith.constant dense<0.000000e+00> : vector<16x128xf32>
    %7 = tpu.matmul %0, %6, %cst {dimension_numbers = #tpu.dot_dimension_numbers<[1], [0], [0], [1], [0, 0, 1, 1], [], []>} : vector<16x256xf32>, vector<256x128xf32>, vector<16x128xf32> -> vector<16x128xf32>
    %c1_9 = arith.constant 1 : index
    %c0_10 = arith.constant 0 : index
    %c0_11 = arith.constant 0 : index
    %8 = vector.load %arg3[%c1_9, %c0_10, %c0_11] : memref<3x256x128xf32, #tpu.memory_space<vmem>>, vector<1x256x128xf32>
    %9 = vector.shape_cast %8 : vector<1x256x128xf32> to vector<256x128xf32>
    %cst_12 = arith.constant dense<0.000000e+00> : vector<16x128xf32>
    %10 = tpu.matmul %0, %9, %cst_12 {dimension_numbers = #tpu.dot_dimension_numbers<[1], [0], [0], [1], [0, 0, 1, 1], [], []>} : vector<16x256xf32>, vector<256x128xf32>, vector<16x128xf32> -> vector<16x128xf32>
    %c2 = arith.constant 2 : index
    %c0_13 = arith.constant 0 : index
    %c0_14 = arith.constant 0 : index
    %11 = vector.load %arg3[%c2, %c0_13, %c0_14] : memref<3x256x128xf32, #tpu.memory_space<vmem>>, vector<1x256x128xf32>
    %12 = vector.shape_cast %11 : vector<1x256x128xf32> to vector<256x128xf32>
    %cst_15 = arith.constant dense<0.000000e+00> : vector<16x128xf32>
    %13 = tpu.matmul %0, %12, %cst_15 {dimension_numbers = #tpu.dot_dimension_numbers<[1], [0], [0], [1], [0, 0, 1, 1], [], []>} : vector<16x256xf32>, vector<256x128xf32>, vector<16x128xf32> -> vector<16x128xf32>
    %cst_16 = arith.constant dense<0.000000e+00> : vector<16x128xf32>
    %14 = tpu.matmul %2, %7, %cst_16 {dimension_numbers = #tpu.dot_dimension_numbers<[1], [0], [0], [1], [0, 0, 1, 1], [], []>} : vector<16x16xf32>, vector<16x128xf32>, vector<16x128xf32> -> vector<16x128xf32>
    %15 = arith.addf %14, %10 : vector<16x128xf32>
    %cst_17 = arith.constant dense<0.000000e+00> : vector<16x128xf32>
    %16 = tpu.matmul %4, %13, %cst_17 {dimension_numbers = #tpu.dot_dimension_numbers<[1], [0], [0], [1], [0, 0, 1, 1], [], []>} : vector<16x16xf32>, vector<16x128xf32>, vector<16x128xf32> -> vector<16x128xf32>
    %17 = arith.addf %15, %16 : vector<16x128xf32>
    %c0_18 = arith.constant 0 : index
    %c0_19 = arith.constant 0 : index
    %18 = vector.load %arg5[%c0_18, %c0_19] : memref<1x128xf32, #tpu.memory_space<vmem>>, vector<1x128xf32>
    %19 = vector.broadcast %18 : vector<1x128xf32> to vector<16x128xf32>
    %20 = arith.mulf %17, %19 : vector<16x128xf32>
    %c0_20 = arith.constant 0 : index
    %c0_21 = arith.constant 0 : index
    %21 = vector.load %arg6[%c0_20, %c0_21] : memref<1x128xf32, #tpu.memory_space<vmem>>, vector<1x128xf32>
    %22 = vector.broadcast %21 : vector<1x128xf32> to vector<16x128xf32>
    %23 = arith.addf %20, %22 : vector<16x128xf32>
    %cst_22 = arith.constant 0.000000e+00 : f32
    %24 = vector.broadcast %cst_22 : f32 to vector<16x128xf32>
    %25 = arith.maximumf %23, %24 : vector<16x128xf32>
    %c0_23 = arith.constant 0 : index
    %c0_24 = arith.constant 0 : index
    %c0_25 = arith.constant 0 : index
    %26 = vector.load %arg4[%c0_23, %c0_24, %c0_25] : memref<3x128x128xf32, #tpu.memory_space<vmem>>, vector<1x128x128xf32>
    %27 = vector.shape_cast %26 : vector<1x128x128xf32> to vector<128x128xf32>
    %cst_26 = arith.constant dense<0.000000e+00> : vector<16x128xf32>
    %28 = tpu.matmul %25, %27, %cst_26 {dimension_numbers = #tpu.dot_dimension_numbers<[1], [0], [0], [1], [0, 0, 1, 1], [], []>} : vector<16x128xf32>, vector<128x128xf32>, vector<16x128xf32> -> vector<16x128xf32>
    %c1_27 = arith.constant 1 : index
    %c0_28 = arith.constant 0 : index
    %c0_29 = arith.constant 0 : index
    %29 = vector.load %arg4[%c1_27, %c0_28, %c0_29] : memref<3x128x128xf32, #tpu.memory_space<vmem>>, vector<1x128x128xf32>
    %30 = vector.shape_cast %29 : vector<1x128x128xf32> to vector<128x128xf32>
    %cst_30 = arith.constant dense<0.000000e+00> : vector<16x128xf32>
    %31 = tpu.matmul %25, %30, %cst_30 {dimension_numbers = #tpu.dot_dimension_numbers<[1], [0], [0], [1], [0, 0, 1, 1], [], []>} : vector<16x128xf32>, vector<128x128xf32>, vector<16x128xf32> -> vector<16x128xf32>
    %c2_31 = arith.constant 2 : index
    %c0_32 = arith.constant 0 : index
    %c0_33 = arith.constant 0 : index
    %32 = vector.load %arg4[%c2_31, %c0_32, %c0_33] : memref<3x128x128xf32, #tpu.memory_space<vmem>>, vector<1x128x128xf32>
    %33 = vector.shape_cast %32 : vector<1x128x128xf32> to vector<128x128xf32>
    %cst_34 = arith.constant dense<0.000000e+00> : vector<16x128xf32>
    %34 = tpu.matmul %25, %33, %cst_34 {dimension_numbers = #tpu.dot_dimension_numbers<[1], [0], [0], [1], [0, 0, 1, 1], [], []>} : vector<16x128xf32>, vector<128x128xf32>, vector<16x128xf32> -> vector<16x128xf32>
    %cst_35 = arith.constant dense<0.000000e+00> : vector<16x128xf32>
    %35 = tpu.matmul %2, %28, %cst_35 {dimension_numbers = #tpu.dot_dimension_numbers<[1], [0], [0], [1], [0, 0, 1, 1], [], []>} : vector<16x16xf32>, vector<16x128xf32>, vector<16x128xf32> -> vector<16x128xf32>
    %36 = arith.addf %35, %31 : vector<16x128xf32>
    %cst_36 = arith.constant dense<0.000000e+00> : vector<16x128xf32>
    %37 = tpu.matmul %4, %34, %cst_36 {dimension_numbers = #tpu.dot_dimension_numbers<[1], [0], [0], [1], [0, 0, 1, 1], [], []>} : vector<16x16xf32>, vector<16x128xf32>, vector<16x128xf32> -> vector<16x128xf32>
    %38 = arith.addf %36, %37 : vector<16x128xf32>
    %c0_37 = arith.constant 0 : index
    %c0_38 = arith.constant 0 : index
    %39 = vector.load %arg7[%c0_37, %c0_38] : memref<1x128xf32, #tpu.memory_space<vmem>>, vector<1x128xf32>
    %40 = vector.broadcast %39 : vector<1x128xf32> to vector<16x128xf32>
    %41 = arith.mulf %38, %40 : vector<16x128xf32>
    %c0_39 = arith.constant 0 : index
    %c0_40 = arith.constant 0 : index
    %42 = vector.load %arg8[%c0_39, %c0_40] : memref<1x128xf32, #tpu.memory_space<vmem>>, vector<1x128xf32>
    %43 = vector.broadcast %42 : vector<1x128xf32> to vector<16x128xf32>
    %44 = arith.addf %41, %43 : vector<16x128xf32>
    %cst_41 = arith.constant 0.000000e+00 : f32
    %45 = vector.broadcast %cst_41 : f32 to vector<16x128xf32>
    %46 = arith.maximumf %44, %45 : vector<16x128xf32>
    %c0_42 = arith.constant 0 : index
    %c0_43 = arith.constant 0 : index
    %47 = vector.load %arg9[%c0_42, %c0_43] : memref<16x128xf32, #tpu.memory_space<vmem>>, vector<16x128xf32>
    tpu.vector_store %arg9[%c0_42, %c0_43], %46 {strides = array<i32>} : memref<16x128xf32, #tpu.memory_space<vmem>>, vector<16x128xf32>,
    return
  }
  func.func @transform_0(%arg0: i32) -> (i32, i32) {
    %c0_i32 = arith.constant 0 : i32
    %c0_i32_0 = arith.constant 0 : i32
    %c0_i32_1 = arith.constant 0 : i32
    return %c0_i32, %c0_i32_0 : i32, i32
  }
  func.func @transform_1(%arg0: i32) -> (i32, i32, i32) {
    %c0_i32 = arith.constant 0 : i32
    %c0_i32_0 = arith.constant 0 : i32
    %c0_i32_1 = arith.constant 0 : i32
    %c0_i32_2 = arith.constant 0 : i32
    return %c0_i32, %c0_i32_0, %c0_i32_1 : i32, i32, i32
  }
  func.func @transform_2(%arg0: i32) -> (i32, i32, i32) {
    %c0_i32 = arith.constant 0 : i32
    %c0_i32_0 = arith.constant 0 : i32
    %c0_i32_1 = arith.constant 0 : i32
    %c0_i32_2 = arith.constant 0 : i32
    return %c0_i32, %c0_i32_0, %c0_i32_1 : i32, i32, i32
  }
  func.func @transform_3(%arg0: i32) -> (i32, i32, i32) {
    %c0_i32 = arith.constant 0 : i32
    %c0_i32_0 = arith.constant 0 : i32
    %c0_i32_1 = arith.constant 0 : i32
    %c0_i32_2 = arith.constant 0 : i32
    return %c0_i32, %c0_i32_0, %c0_i32_1 : i32, i32, i32
  }
  func.func @transform_4(%arg0: i32) -> (i32, i32) {
    %c0_i32 = arith.constant 0 : i32
    %c0_i32_0 = arith.constant 0 : i32
    %c0_i32_1 = arith.constant 0 : i32
    return %c0_i32, %c0_i32_0 : i32, i32
  }
  func.func @transform_5(%arg0: i32) -> (i32, i32) {
    %c0_i32 = arith.constant 0 : i32
    %c0_i32_0 = arith.constant 0 : i32
    %c0_i32_1 = arith.constant 0 : i32
    return %c0_i32, %c0_i32_0 : i32, i32
  }
  func.func @transform_6(%arg0: i32) -> (i32, i32) {
    %c0_i32 = arith.constant 0 : i32
    %c0_i32_0 = arith.constant 0 : i32
    %c0_i32_1 = arith.constant 0 : i32
    return %c0_i32, %c0_i32_0 : i32, i32
  }
  func.func @transform_7(%arg0: i32) -> (i32, i32) {
    %c0_i32 = arith.constant 0 : i32
    %c0_i32_0 = arith.constant 0 : i32
    %c0_i32_1 = arith.constant 0 : i32
    return %c0_i32, %c0_i32_0 : i32, i32
  }
  func.func @transform_8(%arg0: i32) -> (i32, i32) {
    %c0_i32 = arith.constant 0 : i32
    %c0_i32_0 = arith.constant 0 : i32
    %c0_i32_1 = arith.constant 0 : i32
    return %c0_i32, %c0_i32_0 : i32, i32
  }
}

</mosaic_0001>

<bundles_post_ra>
// kernel: up_forward.1
= control target key start
LH: loop header
LB: loop body
LE: loop exit
PB: predicated region body
PF: predicated region fallthrough
CT: control target
= control target key end

     0   :  { %vm361_vm0 = vcmask 130048   ;;  %s2205_s2 = inlined_call_operand.vmem [shape: f32[3,256,128], index: 2, kind: input, shape index: {}]   ;;  %s2206_s0 = inlined_call_operand.vmem [shape: f32[16,256], index: 0, kind: input, shape index: {}]   ;;  %s2207_s1 = inlined_call_operand.vmem [shape: f32[2,16,16], index: 1, kind: input, shape index: {}]   ;;  %s2208_s3 = inlined_call_operand.vmem [shape: f32[3,128,128], index: 3, kind: input, shape index: {}]   ;;  %s2209_s4 = inlined_call_operand.vmem [shape: f32[1,128], index: 4, kind: input, shape index: {}]   ;;  %s2210_s5 = inlined_call_operand.vmem [shape: f32[1,128], index: 5, kind: input, shape index: {}]   ;;  %s2211_s6 = inlined_call_operand.vmem [shape: f32[1,128], index: 6, kind: input, shape index: {}]   ;;  %s2212_s7 = inlined_call_operand.vmem [shape: f32[1,128], index: 7, kind: input, shape index: {}]   ;;  %s2213_s8 = inlined_call_operand.vmem [shape: f32[16,128], index: 8, kind: output, shape index: {}]  }
   0x1   :  { %v54_v0 = vld [vmem:[%s2205_s2 + $0x80] sm:$0xff]  ;;  %v55_v1 = vld [vmem:[%s2205_s2 + $0x88] sm:$0xff]  ;;  %v56_v5 = vld [vmem:[%s2205_s2 + $0x90] sm:$0xff] }
   0x2   :  { %v38_v2 = vld [vmem:[%s2205_s2] sm:$0xff]  ;;  %v1426_v3 = vpack.c.bf16 %v55_v1, %v54_v0  ;;  %v39_v4 = vld [vmem:[%s2205_s2 + $0x8] sm:$0xff]  ;;  %v57_v6 = vld [vmem:[%s2205_s2 + $0x98] sm:$0xff] }
   0x3   :  { %v1428_v7 = vpack.c.bf16 %v39_v4, %v38_v2  ;;  %v1430_v8 = vpack.c.bf16 %v57_v6, %v56_v5  ;;  %v40_v9 = vld [vmem:[%s2205_s2 + $0x10] sm:$0xff]  ;;  %v41_v10 = vld [vmem:[%s2205_s2 + $0x18] sm:$0xff]  ;;  %v58_v11 = vld [vmem:[%s2205_s2 + $0xa0] sm:$0xff] }
   0x4   :  { %1427 = vmatprep.subr.bf16.mxu0 %v1426_v3  ;;  %v59_v12 = vld [vmem:[%s2205_s2 + $0xa8] sm:$0xff]  ;;  %v1432_v13 = vpack.c.bf16 %v41_v10, %v40_v9  ;;  %v42_v15 = vld [vmem:[%s2205_s2 + $0x20] sm:$0xff]  ;;  %v60_v17 = vld [vmem:[%s2205_s2 + $0xb0] sm:$0xff] }
   0x5   :  { %1429 = vmatpush3.bf16.msra.mxu0 %v1428_v7  ;;  %v1434_v14 = vpack.c.bf16 %v59_v12, %v58_v11  ;;  %v43_v16 = vld [vmem:[%s2205_s2 + $0x28] sm:$0xff]  ;;  %v61_v18 = vld [vmem:[%s2205_s2 + $0xb8] sm:$0xff]  ;;  %v44_v21 = vld [vmem:[%s2205_s2 + $0x30] sm:$0xff] }
   0x6   :  { %1431 = vmatprep.subr.bf16.mxu0 %v1430_v8  ;;  %v1436_v19 = vpack.c.bf16 %v43_v16, %v42_v15  ;;  %v1438_v20 = vpack.c.bf16 %v61_v18, %v60_v17  ;;  %v45_v22 = vld [vmem:[%s2205_s2 + $0x38] sm:$0xff]  ;;  %v62_v23 = vld [vmem:[%s2205_s2 + $0xc0] sm:$0xff]  ;;  %v63_v24 = vld [vmem:[%s2205_s2 + $0xc8] sm:$0xff] }
   0x7   :  { %v1744_v25 = vld [vmem:[%s2206_s0 + $0x8] sm:$0xff]  ;;  %v1440_v26 = vpack.c.bf16 %v45_v22, %v44_v21  ;;  %v1442_v27 = vpack.c.bf16 %v63_v24, %v62_v23  ;;  %v46_v28 = vld [vmem:[%s2205_s2 + $0x40] sm:$0xff]  ;;  %v64_v30 = vld [vmem:[%s2205_s2 + $0xd0] sm:$0xff] }
   0x8   :  { %134 = vmatprep.mubr.f32.mxu0 %v1744_v25  ;;  %242 = vmatprep.mubr.f32.mxu1 %v1744_v25  ;;  %v47_v29 = vld [vmem:[%s2205_s2 + $0x48] sm:$0xff]  ;;  %v65_v31 = vld [vmem:[%s2205_s2 + $0xd8] sm:$0xff]  ;;  %v48_v34 = vld [vmem:[%s2205_s2 + $0x50] sm:$0xff] }
   0x9   :  { %1433 = vmatpush3.bf16.msra.mxu0 %v1432_v13  ;;  %v1444_v32 = vpack.c.bf16 %v47_v29, %v46_v28  ;;  %v1446_v33 = vpack.c.bf16 %v65_v31, %v64_v30  ;;  %v49_v35 = vld [vmem:[%s2205_s2 + $0x58] sm:$0xff]  ;;  %v66_v36 = vld [vmem:[%s2205_s2 + $0xe0] sm:$0xff]  ;;  %v67_v37 = vld [vmem:[%s2205_s2 + $0xe8] sm:$0xff] }
   0xa   :  { %1435 = vmatprep.subr.bf16.mxu0 %v1434_v14  ;;  %v1448_v38 = vpack.c.bf16 %v49_v35, %v48_v34  ;;  %v1450_v39 = vpack.c.bf16 %v67_v37, %v66_v36  ;;  %v50_v40 = vld [vmem:[%s2205_s2 + $0x60] sm:$0xff]  ;;  %v51_v41 = vld [vmem:[%s2205_s2 + $0x68] sm:$0xff]  ;;  %v68_v42 = vld [vmem:[%s2205_s2 + $0xf0] sm:$0xff] }
   0xb   :  { %v69_v43 = vld [vmem:[%s2205_s2 + $0xf8] sm:$0xff]  ;;  %v1017_v44 = vld [vmem:[%s2205_s2 + $0x180] sm:$0xff]  ;;  %v52_v45 = vld [vmem:[%s2205_s2 + $0x70] sm:$0xff]  ;;  %v1452_v50 = vpack.c.bf16 %v51_v41, %v50_v40 }
   0xc   :  { %v53_v46 = vld [vmem:[%s2205_s2 + $0x78] sm:$0xff]  ;;  %v1018_v47 = vld [vmem:[%s2205_s2 + $0x188] sm:$0xff]  ;;  %v1001_v48 = vld [vmem:[%s2205_s2 + $0x100] sm:$0xff]  ;;  %v1454_v56 = vpack.c.bf16 %v69_v43, %v68_v42 }
   0xd   :  { %1437 = vmatpush3.bf16.msra.mxu0 %v1436_v19  ;;  %v1002_v49 = vld [vmem:[%s2205_s2 + $0x108] sm:$0xff]  ;;  %v1458_v51 = vpack.c.bf16 %v1018_v47, %v1017_v44  ;;  %v1019_v53 = vld [vmem:[%s2205_s2 + $0x190] sm:$0xff]  ;;  %v1020_v54 = vld [vmem:[%s2205_s2 + $0x198] sm:$0xff]  ;;  %v1456_v0 = vpack.c.bf16 %v53_v46, %v52_v45 }
   0xe   :  { %1439 = vmatprep.subr.bf16.mxu0 %v1438_v20  ;;  %v1460_v52 = vpack.c.bf16 %v1002_v49, %v1001_v48  ;;  %v1003_v55 = vld [vmem:[%s2205_s2 + $0x110] sm:$0xff]  ;;  %v1462_v57 = vpack.c.bf16 %v1020_v54, %v1019_v53  ;;  %v1004_v58 = vld [vmem:[%s2205_s2 + $0x118] sm:$0xff]  ;;  %v1021_v59 = vld [vmem:[%s2205_s2 + $0x1a0] sm:$0xff] }
   0xf   :  { %v1022_v60 = vld [vmem:[%s2205_s2 + $0x1a8] sm:$0xff]  ;;  %v1049_v61 = vld [vmem:[%s2205_s2 + $0x280] sm:$0xff]  ;;  %1459 = vmatprep.subr.bf16.mxu1 %v1458_v51  ;;  %v1464_v63 = vpack.c.bf16 %v1004_v58, %v1003_v55  ;;  %v1051_v7 = vld [vmem:[%s2205_s2 + $0x290] sm:$0xff] }
  0x10   :  { %v1050_v62 = vld [vmem:[%s2205_s2 + $0x288] sm:$0xff]  ;;  %1461 = vmatpush3.bf16.msra.mxu1 %v1460_v52  ;;  %v1466_v1 = vpack.c.bf16 %v1022_v60, %v1021_v59  ;;  %v1005_v2 = vld [vmem:[%s2205_s2 + $0x120] sm:$0xff]  ;;  %v1052_v8 = vld [vmem:[%s2205_s2 + $0x298] sm:$0xff] }
  0x11   :  { %1441 = vmatpush3.bf16.msra.mxu0 %v1440_v26  ;;  %1463 = vmatprep.subr.bf16.mxu1 %v1462_v57  ;;  %v1006_v3 = vld [vmem:[%s2205_s2 + $0x128] sm:$0xff]  ;;  %v1490_v4 = vpack.c.bf16 %v1050_v62, %v1049_v61  ;;  %v1033_v5 = vld [vmem:[%s2205_s2 + $0x200] sm:$0xff]  ;;  %v1023_v9 = vld [vmem:[%s2205_s2 + $0x1b0] sm:$0xff]  ;;  %v1494_v17 = vpack.c.bf16 %v1052_v8, %v1051_v7 }
  0x12   :  { %1443 = vmatprep.subr.bf16.mxu0 %v1442_v27  ;;  %v1034_v6 = vld [vmem:[%s2205_s2 + $0x208] sm:$0xff]  ;;  %v1024_v10 = vld [vmem:[%s2205_s2 + $0x1b8] sm:$0xff]  ;;  %v1853_v11 = vld [vmem:[%s2206_s0] sm:$0xff]  ;;  %v1468_v12 = vpack.c.bf16 %v1006_v3, %v1005_v2 }
  0x13   :  { %v1492_v13 = vpack.c.bf16 %v1034_v6, %v1033_v5  ;;  %v1858_v14 = vld [vmem:[%s2206_s0 + $0x18] sm:$0xff]  ;;  %v1007_v15 = vld [vmem:[%s2205_s2 + $0x130] sm:$0xff]  ;;  %v1053_v20 = vld [vmem:[%s2205_s2 + $0x2a0] sm:$0xff]  ;;  %v1470_v21 = vpack.c.bf16 %v1024_v10, %v1023_v9 }
  0x14   :  { %1465 = vmatpush3.bf16.msra.mxu1 %v1464_v63  ;;  %v1008_v16 = vld [vmem:[%s2205_s2 + $0x138] sm:$0xff]  ;;  %v1035_v18 = vld [vmem:[%s2205_s2 + $0x210] sm:$0xff]  ;;  %v1054_v22 = vld [vmem:[%s2205_s2 + $0x2a8] sm:$0xff] }
  0x15   :  { %1445 = vmatpush3.bf16.msra.mxu0 %v1444_v32  ;;  %1467 = vmatprep.subr.bf16.mxu1 %v1466_v1  ;;  %v1036_v19 = vld [vmem:[%s2205_s2 + $0x218] sm:$0xff]  ;;  %v1025_v23 = vld [vmem:[%s2205_s2 + $0x1c0] sm:$0xff]  ;;  %v1026_v24 = vld [vmem:[%s2205_s2 + $0x1c8] sm:$0xff]  ;;  %v1472_v27 = vpack.c.bf16 %v1008_v16, %v1007_v15  ;;  %v1498_v32 = vpack.c.bf16 %v1054_v22, %v1053_v20 }
  0x16   :  { %1447 = vmatprep.subr.bf16.mxu0 %v1446_v33  ;;  %v1888_v26 = vld [vmem:[%s2206_s0 + $0x10] sm:$0xff]  ;;  %v1496_v28 = vpack.c.bf16 %v1036_v19, %v1035_v18  ;;  %v1037_v29 = vld [vmem:[%s2205_s2 + $0x220] sm:$0xff]  ;;  %v1010_v31 = vld [vmem:[%s2205_s2 + $0x148] sm:$0xff]  ;;  %v1474_v34 = vpack.c.bf16 %v1026_v24, %v1025_v23 }
  0x17   :  { %v1009_v30 = vld [vmem:[%s2205_s2 + $0x140] sm:$0xff]  ;;  %v1038_v33 = vld [vmem:[%s2205_s2 + $0x228] sm:$0xff]  ;;  %v1027_v35 = vld [vmem:[%s2205_s2 + $0x1d0] sm:$0xff] }
  0x18   :  { %1469 = vmatpush3.bf16.msra.mxu1 %v1468_v12  ;;  %v1028_v36 = vld [vmem:[%s2205_s2 + $0x1d8] sm:$0xff]  ;;  %v1055_v37 = vld [vmem:[%s2205_s2 + $0x2b0] sm:$0xff]  ;;  %v1500_v40 = vpack.c.bf16 %v1038_v33, %v1037_v29  ;;  %v1058_v47 = vld [vmem:[%s2205_s2 + $0x2c8] sm:$0xff] }
  0x19   :  { %1449 = vmatpush3.bf16.msra.mxu0 %v1448_v38  ;;  %1471 = vmatprep.subr.bf16.mxu1 %v1470_v21  ;;  %v1056_v38 = vld [vmem:[%s2205_s2 + $0x2b8] sm:$0xff]  ;;  %v1478_v41 = vpack.c.bf16 %v1028_v36, %v1027_v35  ;;  %v1011_v42 = vld [vmem:[%s2205_s2 + $0x150] sm:$0xff]  ;;  %v1041_v51 = vld [vmem:[%s2205_s2 + $0x240] sm:$0xff] }
  0x1a   :  { %1451 = vmatprep.subr.bf16.mxu0 %v1450_v39  ;;  %v1476_v39 = vpack.c.bf16 %v1010_v31, %v1009_v30  ;;  %v1012_v43 = vld [vmem:[%s2205_s2 + $0x158] sm:$0xff]  ;;  %v1502_v44 = vpack.c.bf16 %v1056_v38, %v1055_v37  ;;  %v1039_v45 = vld [vmem:[%s2205_s2 + $0x230] sm:$0xff]  ;;  %v1042_v52 = vld [vmem:[%s2205_s2 + $0x248] sm:$0xff] }
  0x1b   :  { %v1040_v46 = vld [vmem:[%s2205_s2 + $0x238] sm:$0xff]  ;;  %v1480_v48 = vpack.c.bf16 %v1012_v43, %v1011_v42  ;;  %v1059_v53 = vld [vmem:[%s2205_s2 + $0x2d0] sm:$0xff]  ;;  %v1508_v55 = vpack.c.bf16 %v1042_v52, %v1041_v51  ;;  %v1061_v59 = vld [vmem:[%s2205_s2 + $0x2e0] sm:$0xff] }
  0x1c   :  { %1473 = vmatpush3.bf16.msra.mxu1 %v1472_v27  ;;  %v1504_v49 = vpack.c.bf16 %v1040_v46, %v1039_v45  ;;  %v1060_v54 = vld [vmem:[%s2205_s2 + $0x2d8] sm:$0xff]  ;;  %v1043_v57 = vld [vmem:[%s2205_s2 + $0x250] sm:$0xff]  ;;  %v1062_v60 = vld [vmem:[%s2205_s2 + $0x2e8] sm:$0xff] }
  0x1d   :  { %1453 = vmatpush3.bf16.msra.mxu0 %v1452_v50  ;;  %1475 = vmatprep.subr.bf16.mxu1 %v1474_v34  ;;  %v1044_v58 = vld [vmem:[%s2205_s2 + $0x258] sm:$0xff]  ;;  %v1514_v62 = vpack.c.bf16 %v1062_v60, %v1061_v59  ;;  %v1045_v63 = vld [vmem:[%s2205_s2 + $0x260] sm:$0xff]  ;;  %v1063_v1 = vld [vmem:[%s2205_s2 + $0x2f0] sm:$0xff] }
  0x1e   :  { %1455 = vmatprep.subr.bf16.mxu0 %v1454_v56  ;;  %v1510_v56 = vpack.c.bf16 %v1060_v54, %v1059_v53  ;;  %v1512_v61 = vpack.c.bf16 %v1044_v58, %v1043_v57  ;;  %v1064_v2 = vld [vmem:[%s2205_s2 + $0x2f8] sm:$0xff]  ;;  %v1047_v5 = vld [vmem:[%s2205_s2 + $0x270] sm:$0xff]  ;;  %v1029_v8 = vld [vmem:[%s2205_s2 + $0x1e0] sm:$0xff] }
  0x1f   :  { %v1048_v6 = vld [vmem:[%s2205_s2 + $0x278] sm:$0xff]  ;;  %v1030_v9 = vld [vmem:[%s2205_s2 + $0x1e8] sm:$0xff]  ;;  %v1013_v12 = vld [vmem:[%s2205_s2 + $0x160] sm:$0xff] }
  0x20   :  { %1477 = vmatpush3.bf16.msra.mxu1 %v1476_v39  ;;  %v1520_v7 = vpack.c.bf16 %v1048_v6, %v1047_v5  ;;  %v1482_v10 = vpack.c.bf16 %v1030_v9, %v1029_v8  ;;  %v1031_v16 = vld [vmem:[%s2205_s2 + $0x1f0] sm:$0xff]  ;;  %v1016_v20 = vld [vmem:[%s2205_s2 + $0x178] sm:$0xff]  ;;  %v2010_v22 = vld [vmem:[%s2207_s1] sm:$0xff] }
  0x21   :  { %1457 = vmatpush3.bf16.msra.mxu0 %v1456_v0  ;;  %1479 = vmatprep.subr.bf16.mxu1 %v1478_v41  ;;  %v1046_v0 = vld [vmem:[%s2205_s2 + $0x268] sm:$0xff]  ;;  %v1015_v19 = vld [vmem:[%s2205_s2 + $0x170] sm:$0xff]  ;;  %v1071_v23 = vld [vmem:[%s2208_s3 + $0x80] sm:$0xff] }
  0x22   :  { %1491 = vmatprep.subr.bf16.mxu0 %v1490_v4  ;;  %v1516_v3 = vpack.c.bf16 %v1046_v0, %v1045_v63  ;;  %v1518_v4 = vpack.c.bf16 %v1064_v2, %v1063_v1  ;;  %v1488_v21 = vpack.c.bf16 %v1016_v20, %v1015_v19  ;;  %v1073_v24 = vld [vmem:[%s2208_s3 + $0x90] sm:$0xff]  ;;  %v1076_v29 = vld [vmem:[%s2208_s3 + $0xa8] sm:$0xff]  ;;  %v1079_v34 = vld [vmem:[%s2208_s3 + $0xc0] sm:$0xff] }
  0x23   :  { %v1077_v31 = vld [vmem:[%s2208_s3 + $0xb0] sm:$0xff]  ;;  %v1080_v35 = vld [vmem:[%s2208_s3 + $0xc8] sm:$0xff]  ;;  %v1082_v38 = vld [vmem:[%s2208_s3 + $0xd8] sm:$0xff] }
  0x24   :  { %135 = vmatmul.mubr.f32.vlgmr.msra.gmra.mrb[0].mxu0 %v1853_v11  ;;  %1481 = vmatpush3.bf16.msra.mxu1 %v1480_v48  ;;  %v1578_v36 = vpack.c.bf16 %v1080_v35, %v1079_v34  ;;  %v1081_v37 = vld [vmem:[%s2208_s3 + $0xd0] sm:$0xff]  ;;  %v546_v53 = vld [vmem:[%s2208_s3] sm:$0xff]  ;;  %v547_v54 = vld [vmem:[%s2208_s3 + $0x8] sm:$0xff] }
  0x25   :  { %1493 = vmatpush3.bf16.msra.mxu0 %v1492_v13  ;;  %139 = vmatprep.mubr.f32.mxu0 %v1858_v14  ;;  %v1014_v13 = vld [vmem:[%s2205_s2 + $0x168] sm:$0xff]  ;;  %v1582_v39 = vpack.c.bf16 %v1082_v38, %v1081_v37  ;;  %v1530_v57 = vpack.c.bf16 %v547_v54, %v546_v53  ;;  %v548_v58 = vld [vmem:[%s2208_s3 + $0x10] sm:$0xff]  ;;  %v549_v59 = vld [vmem:[%s2208_s3 + $0x18] sm:$0xff] }
  0x26   :  { %1495 = vmatprep.subr.bf16.mxu0 %v1494_v17  ;;  %v1484_v15 = vpack.c.bf16 %v1014_v13, %v1013_v12  ;;  %1483 = vmatprep.subr.bf16.mxu1 %v1482_v10  ;;  %v1032_v17 = vld [vmem:[%s2205_s2 + $0x1f8] sm:$0xff]  ;;  %v551_v63 = vld [vmem:[%s2208_s3 + $0x28] sm:$0xff]  ;;  %v552_v1 = vld [vmem:[%s2208_s3 + $0x30] sm:$0xff] }
  0x27   :  { %v1486_v18 = vpack.c.bf16 %v1032_v17, %v1031_v16  ;;  %v2079_v60 = vld [vmem:[%s2207_s1 + $0x18] sm:$0xff]  ;;  %v555_v5 = vld [vmem:[%s2208_s3 + $0x48] sm:$0xff]  ;;  %v1069_v34 = vld [vmem:[%s2209_s4] ss:$0 sm:$0xff] }
  0x28   :  { %140 = vmatmul.mubr.f32.gmra.mrb[2].mxu0 %v1888_v26  ;;  %1485 = vmatpush3.bf16.msra.mxu1 %v1484_v15  ;;  %v553_v2 = vld [vmem:[%s2208_s3 + $0x38] sm:$0xff]  ;;  %v559_v19 = vld [vmem:[%s2208_s3 + $0x68] sm:$0xff]  ;;  %v1070_v37 = vld [vmem:[%s2210_s5] ss:$0 sm:$0xff] }
  0x29   :  { %1497 = vmatpush3.bf16.msra.mxu0 %v1496_v28  ;;  %350 = vmatprep.mubr.f32.mxu0 %v1744_v25  ;;  %v1057_v25 = vld [vmem:[%s2205_s2 + $0x2c0] sm:$0xff]  ;;  %v557_v8 = vld [vmem:[%s2208_s3 + $0x58] sm:$0xff] }
  0x2a   :  { %1499 = vmatprep.subr.bf16.mxu0 %v1498_v32  ;;  %v1506_v50 = vpack.c.bf16 %v1058_v47, %v1057_v25  ;;  %1487 = vmatprep.subr.bf16.mxu1 %v1486_v18  ;;  %v1075_v28 = vld [vmem:[%s2208_s3 + $0xa0] sm:$0xff]  ;;  %v1078_v32 = vld [vmem:[%s2208_s3 + $0xb8] sm:$0xff]  ;;  %v2053_v25 = vld [vmem:[%s2207_s1 + $0x8] sm:$0xff] }
  0x2b   :  { %v1570_v30 = vpack.c.bf16 %v1076_v29, %v1075_v28  ;;  %v1574_v33 = vpack.c.bf16 %v1078_v32, %v1077_v31  ;;  %v2058_v47 = vld [vmem:[%s2207_s1 + $0x10] sm:$0xff]  ;;  %v558_v18 = vld [vmem:[%s2208_s3 + $0x60] sm:$0xff]  ;;  %v1086_v28 = vld [vmem:[%s2208_s3 + $0xf8] sm:$0xff] }
  0x2c   :  { %1489 = vmatpush3.bf16.msra.mxu1 %v1488_v21  ;;  %v1554_v20 = vpack.c.bf16 %v559_v19, %v558_v18  ;;  %v1083_v21 = vld [vmem:[%s2208_s3 + $0xe0] sm:$0xff]  ;;  %v1088_v31 = vld [vmem:[%s2208_s3 + $0x108] sm:$0xff]  ;;  %v1094_v53 = vld [vmem:[%s2208_s3 + $0x138] sm:$0xff] }
  0x2d   :  { %1501 = vmatpush3.bf16.msra.mxu0 %v1500_v40 }
  0x2e   :  { %1503 = vmatprep.subr.bf16.mxu0 %v1502_v44 }
  0x2f   :  { %243 = vmatmul.mubr.f32.vlgmr.msra.gmra.mrb[0].mxu1 %v1853_v11 }
  0x30   :  { %247 = vmatprep.mubr.f32.mxu1 %v1858_v14 }
  0x31   :  { %1505 = vmatpush3.bf16.msra.mxu0 %v1504_v49 }
  0x32   :  { %1507 = vmatprep.subr.bf16.mxu0 %v1506_v50 }
  0x33   :  { %248 = vmatmul.mubr.f32.gmra.mrb[2].mxu1 %v1888_v26 }
  0x34   :  { %1297 = vmatprep.mubr.msk.f32.mxu1 %vm361_vm0, %v2010_v22 }
  0x35   :  { %1509 = vmatpush3.bf16.msra.mxu0 %v1508_v55 }
  0x36   :  { %1511 = vmatprep.subr.bf16.mxu0 %v1510_v56 }
  0x39   :  { %1513 = vmatpush3.bf16.msra.mxu0 %v1512_v61  ;;  %v1534_v61 = vpack.c.bf16 %v549_v59, %v548_v58  ;;  %v1098_v58 = vld [vmem:[%s2208_s3 + $0x158] sm:$0xff] }
  0x3a   :  { %1515 = vmatprep.subr.bf16.mxu0 %v1514_v62  ;;  %v550_v62 = vld [vmem:[%s2208_s3 + $0x20] sm:$0xff] }
  0x3b   :  { %v1538_v0 = vpack.c.bf16 %v551_v63, %v550_v62  ;;  %v1100_v62 = vld [vmem:[%s2208_s3 + $0x168] sm:$0xff] }
  0x3d   :  { %1517 = vmatpush3.bf16.msra.mxu0 %v1516_v3  ;;  %v1542_v3 = vpack.c.bf16 %v553_v2, %v552_v1  ;;  %v1102_v1 = vld [vmem:[%s2208_s3 + $0x178] sm:$0xff] }
  0x3e   :  { %1519 = vmatprep.subr.bf16.mxu0 %v1518_v4  ;;  %v554_v4 = vld [vmem:[%s2208_s3 + $0x40] sm:$0xff] }
  0x3f   :  { %v1546_v6 = vpack.c.bf16 %v555_v5, %v554_v4 }
  0x41   :  { %1521 = vmatpush3.bf16.msra.mxu0 %v1520_v7  ;;  %v556_v7 = vld [vmem:[%s2208_s3 + $0x50] sm:$0xff] }
  0x42   :  { %v1550_v9 = vpack.c.bf16 %v557_v8, %v556_v7 }
  0x44   :  { %351 = vmatmul.mubr.f32.vlgmr.msra.gmra.mrb[4].mxu0 %v1853_v11  ;;  %v1072_v11 = vld [vmem:[%s2208_s3 + $0x88] sm:$0xff] }
  0x45   :  { %355 = vmatprep.mubr.f32.mxu0 %v1858_v14  ;;  %v1562_v14 = vpack.c.bf16 %v1072_v11, %v1071_v23  ;;  %v1084_v23 = vld [vmem:[%s2208_s3 + $0xe8] sm:$0xff] }
  0x46   :  { %v1586_v11 = vpack.c.bf16 %v1084_v23, %v1083_v21 }
  0x47   :  { %1563 = vmatprep.subr.bf16.mxu0 %v1562_v14 }
  0x48   :  { %356 = vmatmul.mubr.f32.gmra.mrb[6].mxu0 %v1888_v26  ;;  %v1074_v26 = vld [vmem:[%s2208_s3 + $0x98] sm:$0xff] }
  0x49   :  { %1565 = vmatpush3.bf16.msra.mxu0 %v1562_v14  ;;  %v1566_v27 = vpack.c.bf16 %v1074_v26, %v1073_v24  ;;  %v560_v14 = vld [vmem:[%s2208_s3 + $0x70] sm:$0xff]  ;;  %v561_v24 = vld [vmem:[%s2208_s3 + $0x78] sm:$0xff] }
  0x4a   :  { %v1558_v26 = vpack.c.bf16 %v561_v24, %v560_v14 }
  0x4b   :  { %1567 = vmatprep.subr.bf16.mxu0 %v1566_v27 }
  0x4d   :  { %1569 = vmatpush3.bf16.msra.mxu0 %v1566_v27  ;;  %v1085_v27 = vld [vmem:[%s2208_s3 + $0xf0] sm:$0xff] }
  0x4e   :  { %1571 = vmatprep.subr.bf16.mxu0 %v1570_v30  ;;  %v1590_v29 = vpack.c.bf16 %v1086_v28, %v1085_v27 }
  0x51   :  { %1573 = vmatpush3.bf16.msra.mxu0 %v1570_v30  ;;  %v1087_v30 = vld [vmem:[%s2208_s3 + $0x100] sm:$0xff] }
  0x52   :  { %1575 = vmatprep.subr.bf16.mxu0 %v1574_v33  ;;  %v1594_v32 = vpack.c.bf16 %v1088_v31, %v1087_v30 }
  0x55   :  { %1577 = vmatpush3.bf16.msra.mxu0 %v1574_v33 }
  0x56   :  { %1579 = vmatprep.subr.bf16.mxu0 %v1578_v36 }
  0x59   :  { %1581 = vmatpush3.bf16.msra.mxu0 %v1578_v36 }
  0x5a   :  { %1583 = vmatprep.subr.bf16.mxu0 %v1582_v39 }
  0x5d   :  { %1585 = vmatpush3.bf16.msra.mxu0 %v1582_v39 }
  0x5e   :  { %1587 = vmatprep.subr.bf16.mxu0 %v1586_v11 }
  0x61   :  { %1589 = vmatpush3.bf16.msra.mxu0 %v1586_v11 }
  0x62   :  { %1591 = vmatprep.subr.bf16.mxu0 %v1590_v29 }
  0x65   :  { %1593 = vmatpush3.bf16.msra.mxu0 %v1590_v29 }
  0xf7   :  { %v1141_v40 = vpop.f32.mrb[0].mxu0 }
  0xf8   :  { %v1142_v41 = vpop.f32.mrb[1].mxu0 }
  0xf9   :  { %v1143_v42 = vadd.f32 %v1142_v41, %v1141_v40 }
  0xfb   :  { %v1144_v43 = vpop.f32.mrb[2].mxu0 }
  0xfc   :  { %v1145_v44 = vpop.f32.mrb[3].mxu0 }
  0xfd   :  { %v1146_v45 = vadd.f32 %v1145_v44, %v1144_v43  ;;  %v1089_v43 = vld [vmem:[%s2208_s3 + $0x110] sm:$0xff]  ;;  %v1090_v44 = vld [vmem:[%s2208_s3 + $0x118] sm:$0xff] }
  0xff   :  { %v1522_v46 = vpack.c.bf16 %v1146_v45, %v1143_v42 }
 0x101   :  { %1523 = vmatprep.subr.bf16.mxu1 %v1522_v46 }
 0x102   :  { %1525 = vmatpush3.bf16.msra.mxu1 %v1522_v46  ;;  %v1179_v10 = vpop.f32.mrb[0].mxu1 }
 0x103   :  { %v1180_v12 = vpop.f32.mrb[1].mxu1 }
 0x104   :  { %v1181_v13 = vadd.f32 %v1180_v12, %v1179_v10 }
 0x105   :  { %1298 = vmatmul.mubr.msk.f32.vlgmr.msra.gmra.mrb[4].mxu1 %vm361_vm0, %v2053_v25 }
 0x106   :  { %1304 = vmatprep.mubr.msk.f32.mxu1 %vm361_vm0, %v2058_v47  ;;  %v1182_v15 = vpop.f32.mrb[2].mxu1 }
 0x107   :  { %v1183_v16 = vpop.f32.mrb[3].mxu1 }
 0x108   :  { %v1184_v17 = vadd.f32 %v1183_v16, %v1182_v15 }
 0x117   :  { %v1217_v48 = vpop.f32.mrb[4].mxu0 }
 0x118   :  { %v1218_v49 = vpop.f32.mrb[5].mxu0 }
 0x119   :  { %v1219_v50 = vadd.f32 %v1218_v49, %v1217_v48  ;;  %v1598_v48 = vpack.c.bf16 %v1090_v44, %v1089_v43  ;;  %v1091_v49 = vld [vmem:[%s2208_s3 + $0x120] sm:$0xff] }
 0x11b   :  { %v1220_v51 = vpop.f32.mrb[6].mxu0 }
 0x11c   :  { %v1221_v52 = vpop.f32.mrb[7].mxu0 }
 0x11d   :  { %v1222_v55 = vadd.f32 %v1221_v52, %v1220_v51  ;;  %v1093_v52 = vld [vmem:[%s2208_s3 + $0x130] sm:$0xff] }
 0x11e   :  { %v1606_v54 = vpack.c.bf16 %v1094_v53, %v1093_v52 }
 0x11f   :  { %v1526_v56 = vpack.c.bf16 %v1222_v55, %v1219_v50  ;;  %v1092_v50 = vld [vmem:[%s2208_s3 + $0x128] sm:$0xff]  ;;  %v1095_v55 = vld [vmem:[%s2208_s3 + $0x140] sm:$0xff] }
 0x120   :  { %v1602_v51 = vpack.c.bf16 %v1092_v50, %v1091_v49 }
 0x121   :  { %1527 = vmatprep.subr.bf16.mxu1 %v1526_v56 }
 0x122   :  { %1529 = vmatpush3.bf16.msra.mxu1 %v1526_v56  ;;  %v1096_v56 = vld [vmem:[%s2208_s3 + $0x148] sm:$0xff] }
 0x123   :  { %1531 = vmatprep.subr.bf16.mxu1 %v1530_v57 }
 0x125   :  { %1305 = vmatmul.mubr.msk.f32.vlgmr.msra.gmra.mrb[4].mxu1 %vm361_vm0, %v2079_v60 }
 0x126   :  { %1533 = vmatpush3.bf16.msra.mxu1 %v1530_v57  ;;  %v1097_v57 = vld [vmem:[%s2208_s3 + $0x150] sm:$0xff] }
 0x127   :  { %1535 = vmatprep.subr.bf16.mxu1 %v1534_v61  ;;  %v1614_v59 = vpack.c.bf16 %v1098_v58, %v1097_v57 }
 0x12a   :  { %1537 = vmatpush3.bf16.msra.mxu1 %v1534_v61  ;;  %v1099_v61 = vld [vmem:[%s2208_s3 + $0x160] sm:$0xff] }
 0x12b   :  { %1539 = vmatprep.subr.bf16.mxu1 %v1538_v0  ;;  %v1618_v63 = vpack.c.bf16 %v1100_v62, %v1099_v61 }
 0x12e   :  { %1541 = vmatpush3.bf16.msra.mxu1 %v1538_v0  ;;  %v1101_v0 = vld [vmem:[%s2208_s3 + $0x170] sm:$0xff] }
 0x12f   :  { %1543 = vmatprep.subr.bf16.mxu1 %v1542_v3  ;;  %v1622_v2 = vpack.c.bf16 %v1102_v1, %v1101_v0 }
 0x132   :  { %1545 = vmatpush3.bf16.msra.mxu1 %v1542_v3 }
 0x133   :  { %1547 = vmatprep.subr.bf16.mxu1 %v1546_v6 }
 0x136   :  { %1549 = vmatpush3.bf16.msra.mxu1 %v1546_v6 }
 0x137   :  { %1551 = vmatprep.subr.bf16.mxu1 %v1550_v9 }
 0x13a   :  { %1553 = vmatpush3.bf16.msra.mxu1 %v1550_v9  ;;  %v1107_v9 = vld [vmem:[%s2211_s6] ss:$0 sm:$0xff] }
 0x13b   :  { %1555 = vmatprep.subr.bf16.mxu1 %v1554_v20 }
 0x13e   :  { %1557 = vmatpush3.bf16.msra.mxu1 %v1554_v20 }
 0x13f   :  { %1559 = vmatprep.subr.bf16.mxu1 %v1558_v26 }
 0x142   :  { %1561 = vmatpush3.bf16.msra.mxu1 %v1558_v26 }
 0x143   :  { %1595 = vmatprep.subr.bf16.mxu1 %v1594_v32 }
 0x1f8   :  { %v1306_v33 = vpop.f32.mrb[4].mxu1 }
 0x1f9   :  { %v1634_v35 = vadd.f32 %v1306_v33, %v1184_v17  ;;  %v515_v36 = vpop.f32.mrb[5].mxu1 }
 0x1fa   :  { %v1635_v38 = vadd.f32 %v1181_v13, %v515_v36 }
 0x1fb   :  { %v534_v39 = vmul.f32 %v1634_v35, %v1069_v34 }
 0x1fc   :  { %v533_v40 = vmul.f32 %v1635_v38, %v1069_v34 }
 0x1fd   :  { %v543_v41 = vadd.f32 %v1070_v37, %v534_v39 }
 0x1fe   :  { %v542_v42 = vadd.f32 %v1070_v37, %v533_v40 }
 0x1ff   :  { %v545_v46 = vmax.f32 %v543_v41, 0.0 }
 0x200   :  { %v544_v45 = vmax.f32 %v542_v42, 0.0 }
 0x202   :  { %1339 = vmatprep.mubr.f32.mxu1 %v544_v45  ;;  %1374 = vmatprep.mubr.f32.mxu0 %v544_v45 }
 0x203   :  { %1340 = vmatmul.mubr.f32.vlgmr.msra.gmra.mrb[6].mxu1 %v545_v46  ;;  %1375 = vmatmul.mubr.f32.vlgmr.msra.gmra.mrb[8].mxu0 %v545_v46 }
 0x204   :  { %1597 = vmatpush3.bf16.msra.mxu1 %v1594_v32  ;;  %1409 = vmatprep.mubr.f32.mxu1 %v544_v45 }
 0x205   :  { %1599 = vmatprep.subr.bf16.mxu1 %v1598_v48  ;;  %1416 = vmatprep.mubr.msk.f32.mxu0 %vm361_vm0, %v2010_v22  ;;  %v1610_v22 = vpack.c.bf16 %v1096_v56, %v1095_v55 }
 0x208   :  { %1601 = vmatpush3.bf16.msra.mxu1 %v1598_v48 }
 0x209   :  { %1603 = vmatprep.subr.bf16.mxu1 %v1602_v51 }
 0x20c   :  { %1605 = vmatpush3.bf16.msra.mxu1 %v1602_v51 }
 0x20d   :  { %1607 = vmatprep.subr.bf16.mxu1 %v1606_v54 }
 0x210   :  { %1609 = vmatpush3.bf16.msra.mxu1 %v1606_v54 }
 0x211   :  { %1611 = vmatprep.subr.bf16.mxu1 %v1610_v22 }
 0x214   :  { %1613 = vmatpush3.bf16.msra.mxu1 %v1610_v22 }
 0x215   :  { %1615 = vmatprep.subr.bf16.mxu1 %v1614_v59 }
 0x218   :  { %1617 = vmatpush3.bf16.msra.mxu1 %v1614_v59 }
 0x219   :  { %1619 = vmatprep.subr.bf16.mxu1 %v1618_v63 }
 0x21c   :  { %1621 = vmatpush3.bf16.msra.mxu1 %v1618_v63 }
 0x21d   :  { %1623 = vmatprep.subr.bf16.mxu1 %v1622_v2 }
 0x220   :  { %1625 = vmatpush3.bf16.msra.mxu1 %v1622_v2 }
 0x223   :  { %1410 = vmatmul.mubr.f32.vlgmr.msra.gmra.mrb[8].mxu1 %v545_v46 }
 0x2d6   :  { %v1341_v3 = vpop.f32.mrb[6].mxu1 }
 0x2d7   :  { %v628_v4 = vpop.f32.mrb[7].mxu1 }
 0x2d8   :  { %v1626_v5 = vpack.c.bf16 %v1341_v3, %v628_v4 }
 0x2da   :  { %1627 = vmatprep.subr.bf16.mxu0 %v1626_v5 }
 0x2db   :  { %1629 = vmatpush3.bf16.msra.mxu0 %v1626_v5 }
 0x2de   :  { %1417 = vmatmul.mubr.msk.f32.vlgmr.msra.gmra.mrb[8].mxu0 %vm361_vm0, %v2053_v25  ;;  %v1108_v25 = vld [vmem:[%s2212_s7] ss:$0 sm:$0xff] }
 0x2df   :  { %1423 = vmatprep.mubr.msk.f32.mxu0 %vm361_vm0, %v2058_v47 }
 0x2f6   :  { %v1411_v6 = vpop.f32.mrb[8].mxu1 }
 0x2f7   :  { %v812_v7 = vpop.f32.mrb[9].mxu1 }
 0x2f8   :  { %v1630_v8 = vpack.c.bf16 %v1411_v6, %v812_v7 }
 0x2fa   :  { %1631 = vmatprep.subr.bf16.mxu0 %v1630_v8 }
 0x2fb   :  { %1633 = vmatpush3.bf16.msra.mxu0 %v1630_v8 }
 0x2fe   :  { %1424 = vmatmul.mubr.msk.f32.vlgmr.msra.gmra.mrb[8].mxu0 %vm361_vm0, %v2079_v60 }
 0x3d1   :  { %v1425_v10 = vpop.f32.mrb[8].mxu0 }
 0x3d2   :  { %v981_v12 = vmul.f32 %v1425_v10, %v1107_v9  ;;  %v962_v13 = vpop.f32.mrb[9].mxu0 }
 0x3d3   :  { %v980_v47 = vmul.f32 %v1107_v9, %v962_v13 }
 0x3d4   :  { %v990_v15 = vadd.f32 %v1108_v25, %v981_v12 }
 0x3d5   :  { %v989_v16 = vadd.f32 %v1108_v25, %v980_v47 }
 0x3d6   :  { %v992_v17 = vmax.f32 %v990_v15, 0.0 }
 0x3d7   :  { %v991_v18 = vmax.f32 %v989_v16, 0.0 }
 0x3d8   :  { %994 = vst [vmem:[%s2213_s8 + $0x8] sm:$0xff] %v992_v17 }
 0x3d9   :  { %993 = vst [vmem:[%s2213_s8] sm:$0xff] %v991_v18 }

</bundles_post_ra>
